<compile_context>
chip_gen: v6e
topology: v6e:2x2x1
jax: 0.10.0
libtpu: 0.0.40
codegen_flags: <defaults>
</compile_context>

<pallas_src>
import jax
import jax.numpy as jnp
from jax.experimental import pallas as pl
from jax.experimental.pallas import tpu as pltpu


def _twin_qnet_kernel(state_ref, action_ref, w1s_ref, w1a_ref, w2_ref, w3_ref,
                      b_ref, q_ref):
    cdt = w2_ref.dtype                     # MXU operand dtype (f32 or bf16)

    b = b_ref[...]                         # (3, 2H) f32, packed biases
    b1 = b[0:1, :]                         # (1, 2H)
    b2 = b[1:2, :]                         # (1, 2H)
    b3 = b[2:3, 0:2]                       # (1, 2)  -- [b3_q1, b3_q2]

    # Layer 1: fused twin first layer, concat folded into two dots.
    h = (jnp.dot(state_ref[...], w1s_ref[...],
                 preferred_element_type=jnp.float32)
         + jnp.dot(action_ref[...], w1a_ref[...],
                   preferred_element_type=jnp.float32)
         + b1)
    h = jnp.maximum(h, 0.0)

    # Layer 2: block-diagonal fused hidden layer.
    h = jnp.dot(h.astype(cdt), w2_ref[...],
                preferred_element_type=jnp.float32) + b2
    h = jnp.maximum(h, 0.0)

    # Layer 3: fused output head -> (TB, 2); store transposed as a lane-dense
    # (2, TB) block (unmasked full-lane stores; the small transpose rides the
    # otherwise-idle XLU slot).
    q = jnp.dot(h.astype(cdt), w3_ref[...],
                preferred_element_type=jnp.float32) + b3
    q_ref[...] = q.T.astype(q_ref.dtype)


def pack_qnetwork_params(params, num_inputs, weight_dtype=jnp.float32):
    """Pack the two per-net parameter sets into fused kernel operands.

    Per-net weights are stored [in, out]; biases [1, out]. Fusion layout:
      w1s: [num_inputs, 2H], w1a: [num_actions, 2H]
      w2 : [2H, 2H] block-diagonal
      w3 : [2H, 2]  (w3_q1 in col 0 rows 0..H-1, w3_q2 in col 1 rows H..2H-1)
      b  : [3, 2H]  (row0=b1, row1=b2, row2=[b3_q1, b3_q2, 0...])
    """
    p1, p2 = params["q1"], params["q2"]
    H = p1["w1"].shape[1]
    f32 = jnp.float32

    w1 = jnp.concatenate([p1["w1"], p2["w1"]], axis=1)          # [in, 2H]
    w1s = w1[:num_inputs]
    w1a = w1[num_inputs:]

    zHH = jnp.zeros((H, H), f32)
    w2 = jnp.concatenate(
        [jnp.concatenate([p1["w2"], zHH], axis=1),
         jnp.concatenate([zHH, p2["w2"]], axis=1)], axis=0)     # [2H, 2H]

    zH1 = jnp.zeros((H, 1), f32)
    w3 = jnp.concatenate(
        [jnp.concatenate([p1["w3"], zH1], axis=1),
         jnp.concatenate([zH1, p2["w3"]], axis=1)], axis=0)     # [2H, 2]

    b1 = jnp.concatenate([p1["b1"], p2["b1"]], axis=1)          # [1, 2H]
    b2 = jnp.concatenate([p1["b2"], p2["b2"]], axis=1)          # [1, 2H]
    b3 = jnp.concatenate([p1["b3"], p2["b3"],
                          jnp.zeros((1, 2 * H - 2), f32)], axis=1)
    biases = jnp.concatenate([b1, b2, b3], axis=0)              # [3, 2H]

    return {
        "w1s": w1s.astype(weight_dtype),
        "w1a": w1a.astype(weight_dtype),
        "w2": w2.astype(weight_dtype),
        "w3": w3.astype(weight_dtype),
        "b": biases.astype(jnp.float32),   # biases kept f32 (VPU path)
    }


def _round_up(x, m):
    return ((x + m - 1) // m) * m


def qnetwork_forward(state, action, packed, *, tb_cap=1024,
                     activation_dtype=None):
    """Fused twin Q-network forward. Returns (q1, q2), each of shape [B, 1].

    tb_cap: max batch tile (1024 default for v6e/v7x; use 512 on v5e).
    activation_dtype: optional narrow dtype (e.g. jnp.bfloat16) for the
      state/action/h MXU operands; dots still accumulate in float32.
    """
    B, ni = state.shape
    na = action.shape[1]
    twoH = packed["w2"].shape[0]

    if activation_dtype is not None:
        state = state.astype(activation_dtype)
        action = action.astype(activation_dtype)

    # Batch tile: single block for small batches; for training batches use
    # lane-aligned (multiple-of-128) tiles with >= 2 grid steps so the
    # "parallel" batch axis shards across both TensorCores on v7x.
    if B <= 256:
        TB = B
    else:
        TB = min(tb_cap, _round_up(pl.cdiv(B, 2), 128))
    grid = (pl.cdiv(B, TB),)

    batch_map = lambda i: (i, 0)
    const_map = lambda i: (0, 0)
    out_map = lambda i: (0, i)

    nbytes = lambda a: a.size * a.dtype.itemsize
    weight_bytes = sum(nbytes(packed[k]) for k in ("w1s", "w1a", "w2", "w3", "b"))
    flops = 2 * B * ((ni + na) * twoH + twoH * twoH + twoH * 2)
    bytes_accessed = nbytes(state) + nbytes(action) + weight_bytes + B * 2 * 4

    out = pl.pallas_call(
        _twin_qnet_kernel,
        out_shape=jax.ShapeDtypeStruct((2, B), jnp.float32),
        grid=grid,
        in_specs=[
            pl.BlockSpec((TB, ni), batch_map),       # state
            pl.BlockSpec((TB, na), batch_map),       # action
            pl.BlockSpec((ni, twoH), const_map),     # w1 (state part)
            pl.BlockSpec((na, twoH), const_map),     # w1 (action part)
            pl.BlockSpec((twoH, twoH), const_map),   # w2 block-diag
            pl.BlockSpec((twoH, 2), const_map),      # w3 fused head
            pl.BlockSpec((3, twoH), const_map),      # packed biases
        ],
        out_specs=pl.BlockSpec((2, TB), out_map),    # lane-dense output
        compiler_params=pltpu.CompilerParams(
            dimension_semantics=("parallel",)),
        cost_estimate=pl.CostEstimate(
            flops=flops, transcendentals=0, bytes_accessed=bytes_accessed),
    )(state, action, packed["w1s"], packed["w1a"], packed["w2"],
      packed["w3"], packed["b"])

    q1 = out[0, :, None]                             # (B, 1)
    q2 = out[1, :, None]                             # (B, 1)
    return q1, q2


def init_qnet_params(key, in_dim, hidden_dim, init_w=0.003):
    """Deterministic init mimicking the PyTorch module's shapes.

    Weights stored as [in, out] (kernel computes x @ W + b).
    """
    k1, k2, k3, k4, k5, k6 = jax.random.split(key, 6)
    lim1 = 1.0 / jnp.sqrt(in_dim)
    lim2 = 1.0 / jnp.sqrt(hidden_dim)
    return {
        "w1": jax.random.uniform(k1, (in_dim, hidden_dim), jnp.float32, -lim1, lim1),
        "b1": jax.random.uniform(k2, (1, hidden_dim), jnp.float32, -lim1, lim1),
        "w2": jax.random.uniform(k3, (hidden_dim, hidden_dim), jnp.float32, -lim2, lim2),
        "b2": jax.random.uniform(k4, (1, hidden_dim), jnp.float32, -lim2, lim2),
        "w3": jax.random.uniform(k5, (hidden_dim, 1), jnp.float32, -init_w, init_w),
        "b3": jax.random.uniform(k6, (1, 1), jnp.float32, -init_w, init_w),
    }


def _reference_qnet(x, p):
    dot = lambda a, b: jnp.dot(a, b, precision=jax.lax.Precision.HIGHEST)
    h = jax.nn.relu(dot(x, p["w1"]) + p["b1"])
    h = jax.nn.relu(dot(h, p["w2"]) + p["b2"])
    return dot(h, p["w3"]) + p["b3"]


if __name__ == "__main__":
    # Small, module-consistent shapes.
    batch = 8
    num_inputs = 16
    num_actions = 4
    hidden_dim = 32

    key = jax.random.PRNGKey(0)
    k_state, k_action, k_q1, k_q2, k_bstate, k_baction = jax.random.split(key, 6)

    state = jax.random.normal(k_state, (batch, num_inputs), jnp.float32)
    action = jax.random.normal(k_action, (batch, num_actions), jnp.float32)

    params = {
        "q1": init_qnet_params(k_q1, num_inputs + num_actions, hidden_dim),
        "q2": init_qnet_params(k_q2, num_inputs + num_actions, hidden_dim),
    }

    # ---- f32 weights & activations (default; v5e-safe), small batch ----
    packed_f32 = pack_qnetwork_params(params, num_inputs)
    q1, q2 = qnetwork_forward(state, action, packed_f32)
    q1 = jax.block_until_ready(q1)
    q2 = jax.block_until_ready(q2)

    x = jnp.concatenate([state, action], axis=1)
    r1 = _reference_qnet(x, params["q1"])
    r2 = _reference_qnet(x, params["q2"])
    assert q1.shape == (batch, 1) and q2.shape == (batch, 1)
    assert jnp.allclose(q1, r1, atol=1e-4, rtol=1e-4)
    assert jnp.allclose(q2, r2, atol=1e-4, rtol=1e-4)

    # ---- larger batch exercises the multi-step (tiled, dual-TC) path ----
    big_b = 512
    bstate = jax.random.normal(k_bstate, (big_b, num_inputs), jnp.float32)
    baction = jax.random.normal(k_baction, (big_b, num_actions), jnp.float32)
    bq1, bq2 = qnetwork_forward(bstate, baction, packed_f32)
    bq1 = jax.block_until_ready(bq1)
    bq2 = jax.block_until_ready(bq2)
    bx = jnp.concatenate([bstate, baction], axis=1)
    br1 = _reference_qnet(bx, params["q1"])
    br2 = _reference_qnet(bx, params["q2"])
    assert bq1.shape == (big_b, 1) and bq2.shape == (big_b, 1)
    assert jnp.allclose(bq1, br1, atol=1e-4, rtol=1e-4)
    assert jnp.allclose(bq2, br2, atol=1e-4, rtol=1e-4)

    # ---- bf16 weights + bf16 activations (v6e/v7x lever), f32 accumulation ----
    packed_bf16 = pack_qnetwork_params(params, num_inputs,
                                       weight_dtype=jnp.bfloat16)
    q1b, q2b = qnetwork_forward(state, action, packed_bf16,
                                activation_dtype=jnp.bfloat16)
    q1b = jax.block_until_ready(q1b)
    q2b = jax.block_until_ready(q2b)
    assert q1b.shape == (batch, 1) and q2b.shape == (batch, 1)
    assert jnp.allclose(q1b, r1, atol=5e-2, rtol=5e-2)
    assert jnp.allclose(q2b, r2, atol=5e-2, rtol=5e-2)

    print("KERNEL_OK")
</pallas_src>

<mosaic_0001>
module attributes {stable_mosaic.version = 11 : i64} {
  func.func @_twin_qnet_kernel(%arg0: i32, %arg1: memref<8x16xf32, #tpu.memory_space<vmem>>, %arg2: memref<8x4xf32, #tpu.memory_space<vmem>>, %arg3: memref<16x64xf32, #tpu.memory_space<vmem>>, %arg4: memref<4x64xf32, #tpu.memory_space<vmem>>, %arg5: memref<64x64xf32, #tpu.memory_space<vmem>>, %arg6: memref<64x2xf32, #tpu.memory_space<vmem>>, %arg7: memref<3x64xf32, #tpu.memory_space<vmem>>, %arg8: memref<2x8xf32, #tpu.memory_space<vmem>>) attributes {dimension_semantics = [#tpu.dimension_semantics<parallel>], iteration_bounds = array<i64: 1>, scalar_prefetch = 0 : i64, scratch_operands = 0 : i64, tpu.core_type = #tpu.core_type<tc>, window_params = [{transform_indices = @transform_0, window_bounds = array<i64: 8, 16>}, {transform_indices = @transform_1, window_bounds = array<i64: 8, 4>}, {pipeline_mode = #tpu.pipeline_mode<synchronous>, transform_indices = @transform_2, window_bounds = array<i64: 16, 64>}, {pipeline_mode = #tpu.pipeline_mode<synchronous>, transform_indices = @transform_3, window_bounds = array<i64: 4, 64>}, {pipeline_mode = #tpu.pipeline_mode<synchronous>, transform_indices = @transform_4, window_bounds = array<i64: 64, 64>}, {pipeline_mode = #tpu.pipeline_mode<synchronous>, transform_indices = @transform_5, window_bounds = array<i64: 64, 2>}, {pipeline_mode = #tpu.pipeline_mode<synchronous>, transform_indices = @transform_6, window_bounds = array<i64: 3, 64>}, {transform_indices = @transform_7, window_bounds = array<i64: 2, 8>}]} {
    %c0 = arith.constant 0 : index
    %c0_0 = arith.constant 0 : index
    %0 = vector.load %arg7[%c0, %c0_0] : memref<3x64xf32, #tpu.memory_space<vmem>>, vector<3x64xf32>
    %1 = vector.extract_strided_slice %0 {offsets = [0, 0], sizes = [1, 64], strides = [1, 1]} : vector<3x64xf32> to vector<1x64xf32>
    %2 = vector.extract_strided_slice %0 {offsets = [1, 0], sizes = [1, 64], strides = [1, 1]} : vector<3x64xf32> to vector<1x64xf32>
    %3 = vector.extract_strided_slice %0 {offsets = [2, 0], sizes = [1, 2], strides = [1, 1]} : vector<3x64xf32> to vector<1x2xf32>
    %c0_1 = arith.constant 0 : index
    %c0_2 = arith.constant 0 : index
    %4 = vector.load %arg1[%c0_1, %c0_2] : memref<8x16xf32, #tpu.memory_space<vmem>>, vector<8x16xf32>
    %c0_3 = arith.constant 0 : index
    %c0_4 = arith.constant 0 : index
    %5 = vector.load %arg3[%c0_3, %c0_4] : memref<16x64xf32, #tpu.memory_space<vmem>>, vector<16x64xf32>
    %cst = arith.constant dense<0.000000e+00> : vector<8x64xf32>
    %6 = tpu.matmul %4, %5, %cst {dimension_numbers = #tpu.dot_dimension_numbers<[1], [0], [0], [1], [0, 0, 1, 1], [], []>} : vector<8x16xf32>, vector<16x64xf32>, vector<8x64xf32> -> vector<8x64xf32>
    %c0_5 = arith.constant 0 : index
    %c0_6 = arith.constant 0 : index
    %7 = vector.load %arg2[%c0_5, %c0_6] : memref<8x4xf32, #tpu.memory_space<vmem>>, vector<8x4xf32>
    %c0_7 = arith.constant 0 : index
    %c0_8 = arith.constant 0 : index
    %8 = vector.load %arg4[%c0_7, %c0_8] : memref<4x64xf32, #tpu.memory_space<vmem>>, vector<4x64xf32>
    %cst_9 = arith.constant dense<0.000000e+00> : vector<8x64xf32>
    %9 = tpu.matmul %7, %8, %cst_9 {dimension_numbers = #tpu.dot_dimension_numbers<[1], [0], [0], [1], [0, 0, 1, 1], [], []>} : vector<8x4xf32>, vector<4x64xf32>, vector<8x64xf32> -> vector<8x64xf32>
    %10 = arith.addf %6, %9 : vector<8x64xf32>
    %11 = vector.broadcast %1 : vector<1x64xf32> to vector<8x64xf32>
    %12 = arith.addf %10, %11 : vector<8x64xf32>
    %cst_10 = arith.constant 0.000000e+00 : f32
    %13 = vector.broadcast %cst_10 : f32 to vector<8x64xf32>
    %14 = arith.maximumf %12, %13 : vector<8x64xf32>
    %c0_11 = arith.constant 0 : index
    %c0_12 = arith.constant 0 : index
    %15 = vector.load %arg5[%c0_11, %c0_12] : memref<64x64xf32, #tpu.memory_space<vmem>>, vector<64x64xf32>
    %cst_13 = arith.constant dense<0.000000e+00> : vector<8x64xf32>
    %16 = tpu.matmul %14, %15, %cst_13 {dimension_numbers = #tpu.dot_dimension_numbers<[1], [0], [0], [1], [0, 0, 1, 1], [], []>} : vector<8x64xf32>, vector<64x64xf32>, vector<8x64xf32> -> vector<8x64xf32>
    %17 = vector.broadcast %2 : vector<1x64xf32> to vector<8x64xf32>
    %18 = arith.addf %16, %17 : vector<8x64xf32>
    %cst_14 = arith.constant 0.000000e+00 : f32
    %19 = vector.broadcast %cst_14 : f32 to vector<8x64xf32>
    %20 = arith.maximumf %18, %19 : vector<8x64xf32>
    %c0_15 = arith.constant 0 : index
    %c0_16 = arith.constant 0 : index
    %21 = vector.load %arg6[%c0_15, %c0_16] : memref<64x2xf32, #tpu.memory_space<vmem>>, vector<64x2xf32>
    %cst_17 = arith.constant dense<0.000000e+00> : vector<8x2xf32>
    %22 = tpu.matmul %20, %21, %cst_17 {dimension_numbers = #tpu.dot_dimension_numbers<[1], [0], [0], [1], [0, 0, 1, 1], [], []>} : vector<8x64xf32>, vector<64x2xf32>, vector<8x2xf32> -> vector<8x2xf32>
    %23 = vector.broadcast %3 : vector<1x2xf32> to vector<8x2xf32>
    %24 = arith.addf %22, %23 : vector<8x2xf32>
    %25 = tpu.transpose %24, [1, 0] : vector<8x2xf32> -> vector<2x8xf32>
    %c0_18 = arith.constant 0 : index
    %c0_19 = arith.constant 0 : index
    %26 = vector.load %arg8[%c0_18, %c0_19] : memref<2x8xf32, #tpu.memory_space<vmem>>, vector<2x8xf32>
    tpu.vector_store %arg8[%c0_18, %c0_19], %25 {strides = array<i32>} : memref<2x8xf32, #tpu.memory_space<vmem>>, vector<2x8xf32>,
    return
  }
  func.func @transform_0(%arg0: i32) -> (i32, i32) {
    %c0_i32 = arith.constant 0 : i32
    %c0_i32_0 = arith.constant 0 : i32
    return %arg0, %c0_i32 : i32, i32
  }
  func.func @transform_1(%arg0: i32) -> (i32, i32) {
    %c0_i32 = arith.constant 0 : i32
    %c0_i32_0 = arith.constant 0 : i32
    return %arg0, %c0_i32 : i32, i32
  }
  func.func @transform_2(%arg0: i32) -> (i32, i32) {
    %c0_i32 = arith.constant 0 : i32
    %c0_i32_0 = arith.constant 0 : i32
    %c0_i32_1 = arith.constant 0 : i32
    return %c0_i32, %c0_i32_0 : i32, i32
  }
  func.func @transform_3(%arg0: i32) -> (i32, i32) {
    %c0_i32 = arith.constant 0 : i32
    %c0_i32_0 = arith.constant 0 : i32
    %c0_i32_1 = arith.constant 0 : i32
    return %c0_i32, %c0_i32_0 : i32, i32
  }
  func.func @transform_4(%arg0: i32) -> (i32, i32) {
    %c0_i32 = arith.constant 0 : i32
    %c0_i32_0 = arith.constant 0 : i32
    %c0_i32_1 = arith.constant 0 : i32
    return %c0_i32, %c0_i32_0 : i32, i32
  }
  func.func @transform_5(%arg0: i32) -> (i32, i32) {
    %c0_i32 = arith.constant 0 : i32
    %c0_i32_0 = arith.constant 0 : i32
    %c0_i32_1 = arith.constant 0 : i32
    return %c0_i32, %c0_i32_0 : i32, i32
  }
  func.func @transform_6(%arg0: i32) -> (i32, i32) {
    %c0_i32 = arith.constant 0 : i32
    %c0_i32_0 = arith.constant 0 : i32
    %c0_i32_1 = arith.constant 0 : i32
    return %c0_i32, %c0_i32_0 : i32, i32
  }
  func.func @transform_7(%arg0: i32) -> (i32, i32) {
    %c0_i32 = arith.constant 0 : i32
    %c0_i32_0 = arith.constant 0 : i32
    return %c0_i32, %arg0 : i32, i32
  }
}

</mosaic_0001>

<bundles_post_ra>
// kernel: tpu_custom_call.1
= control target key start
LH: loop header
LB: loop body
LE: loop exit
PB: predicated region body
PF: predicated region fallthrough
CT: control target
= control target key end

     0   :  { %12 = vsyncpa [#allocation3], 0  ;;  %s692_s0 = inlined_call_operand.hbm [shape: f32[8,16], index: 0, kind: input, shape index: {}]   ;;  %s693_s1 = inlined_call_operand.vmem [shape: f32[8,4], index: 1, kind: input, shape index: {}]   ;;  %s694_s2 = inlined_call_operand.vmem [shape: f32[16,64], index: 2, kind: input, shape index: {}]   ;;  %s695_s3 = inlined_call_operand.vmem [shape: f32[4,64], index: 3, kind: input, shape index: {}]   ;;  %s696_s4 = inlined_call_operand.vmem [shape: f32[64,64], index: 4, kind: input, shape index: {}]   ;;  %s697_s5 = inlined_call_operand.vmem [shape: f32[64,2], index: 5, kind: input, shape index: {}]   ;;  %s698_s6 = inlined_call_operand.vmem [shape: f32[3,64], index: 6, kind: input, shape index: {}]   ;;  %s699_s7 = inlined_call_operand.hbm [shape: f32[2,8], index: 7, kind: output, shape index: {}]  }
   0x1   :  { %13 = vsyncpa [#allocation4], 0  ;;  %s550_s24 = smov [#allocation2]  }
   0x2   :  { %s20_s25 = sshll.u32 %s550_s24, 4  ;;  %s21_s25 = int_to_ptr.vmem [resolvable:$true] %s20_s25 }
   0x3   :  { %s514_s26 = scalar_lea.vmem %s21_s25, 128  ;;  %p519_p1 = scmp.lt.s32.totalorder %s21_s25, %s21_s25 }
   0x4   :  { %p515_p0 = scmp.ne.s32.totalorder %s21_s25, %s514_s26  ;;  %p520_p2 = scmp.lt.s32.totalorder %s514_s26, %s514_s26 }
   0x6   :  { %p521_p3 = por %p520_p2, %p519_p1 }
   0x8   :  { %p522_p4 = pnand %p521_p3, %p515_p0 }
   0xa   :  { %525 = shalt.err (!%p522_p4)
}
   0xb   :  { %23 = dma.hbm_to_vmem [thread:$0]  %s692_s0, 128, %s21_s25, [#allocation3]  }
   0xc   :  { %546 = dma.done.wait [#allocation3], 128  }
   0xd   :  { %547 = vsyncadd [#allocation3], 4294967168  ;;  %v551_v0 = vmov 0.0   ;;  %vm552_vm0 = vmmov 0   ;;  %vm49_vm1 = vcmask 1043456   ;;  %vm45_vm2 = vcmask 31744  }
   0xe   :  { %452 = vmatprep.subr.mxu0 %v551_v0  ;;  %457 = vmatprep.subr.mxu1 %v551_v0  ;;  %v44_v1 = vld [vmem:[%s695_s3] sm:$0xf]  ;;  %v42_v2 = vld [vmem:[%s694_s2 + $0x8] sm:$0xff]  ;;  %vm123_vm3 = vcmask 130048   ;;  %v210_v6 = vld [vmem:[%s696_s4 + $0x38] sm:$0xff]  ;;  %v197_v19 = vlaneseq  ;;  %vm215_vm4 = vcmask 523264  }
   0xf   :  { %454 = vmatprep.mubr.msk.f32.mxu0 %vm552_vm0, %v551_v0  ;;  %461 = vmatprep.mubr.msk.f32.mxu1 %vm552_vm0, %v551_v0  ;;  %v43_v3 = vld [vmem:[%s693_s1] sm:$0xff]  ;;  %v209_v7 = vld [vmem:[%s696_s4 + $0x30] sm:$0xff]  ;;  %v208_v8 = vld [vmem:[%s696_s4 + $0x28] sm:$0xff]  ;;  %s553_s15 = smov [#allocation5]   ;;  %vm407_vm5 = vcmask 58368  }
  0x10   :  { %453 = vmatpush3.msk.msra.mxu0 %vm49_vm1, %v44_v1  ;;  %458 = vmatpush3.msra.mxu1 %v42_v2  ;;  %v41_v4 = vld [vmem:[%s694_s2] sm:$0xff]  ;;  %v206_v10 = vld [vmem:[%s696_s4 + $0x18] sm:$0xff]  ;;  %v205_v11 = vld [vmem:[%s696_s4 + $0x10] sm:$0xff]  ;;  %v198_v20 = vshrl.u32 %v197_v19, 7  ;;  %s415_s16 = sshll.u32 %s553_s15, 4  ;;  %s416_s16 = int_to_ptr.vmem [resolvable:$true] %s415_s16 }
  0x11   :  { %v40_v5 = vld [vmem:[#allocation2] sm:$0xff]  ;;  %455 = vmatmul.mubr.msk.f32.vlgmr.msra.gmra.mxu0 %vm45_vm2, %v43_v3  ;;  %459 = vmatprep.subr.mxu1 %v551_v0  ;;  %v204_v12 = vld [vmem:[%s696_s4 + $0x8] sm:$0xff]  ;;  %v297_v14 = vld [vmem:[%s697_s5 + $0x38] sm:$0xff]  ;;  %p531_p6 = scmp.lt.s32.totalorder %s416_s16, %s416_s16 }
  0x12   :  { %460 = vmatpush3.msra.mxu1 %v41_v4  ;;  %464 = vmatprep.subr.mxu0 %v551_v0  ;;  %v207_v9 = vld [vmem:[%s696_s4 + $0x20] sm:$0xff]  ;;  %v296_v15 = vld [vmem:[%s697_s5 + $0x30] sm:$0xff]  ;;  %v295_v16 = vld [vmem:[%s697_s5 + $0x28] sm:$0xff]  ;;  %v199_v21 = vsub.s32 0, %v198_v20  ;;  %v213_v34 = vsub.s32 1, %v198_v20  ;;  %v300_v40 = vsub.s32 2, %v198_v20 }
  0x13   :  { %462 = vmatmul.mubr.msk.f32.vlgmr.msra.gmra.mxu1 %vm123_vm3, %v40_v5  ;;  %465 = vmatpush3.msra.mxu0 %v210_v6  ;;  %v203_v13 = vld [vmem:[%s696_s4] sm:$0xff]  ;;  %v293_v18 = vld [vmem:[%s697_s5 + $0x18] sm:$0xff]  ;;  %v292_v31 = vld [vmem:[%s697_s5 + $0x10] sm:$0xff] }
  0x14   :  { %466 = vmatprep.subr.mxu0 %v551_v0  ;;  %480 = vmatprep.mubr.msk.f32.mxu0 %vm552_vm0, %v551_v0  ;;  %v294_v17 = vld [vmem:[%s697_s5 + $0x20] sm:$0xff]  ;;  %v291_v32 = vld [vmem:[%s697_s5 + $0x8] sm:$0xff] }
  0x15   :  { %467 = vmatpush3.msra.mxu0 %v209_v7  ;;  %483 = vmatprep.subr.mxu1 %v551_v0  ;;  %v39_v22 = vld [vmem:[%s698_s6] sm:$0x7] }
  0x16   :  { %468 = vmatprep.subr.mxu0 %v551_v0  ;;  %499 = vmatprep.mubr.msk.f32.mxu1 %vm552_vm0, %v551_v0  ;;  %v200_v24 = vrot.slane %v39_v22, %v199_v21  ;;  %v290_v33 = vld [vmem:[%s697_s5] sm:$0xff]  ;;  %v214_v35 = vrot.slane %v39_v22, %v213_v34  ;;  %v301_v41 = vrot.slane %v39_v22, %v300_v40  ;;  %s526_s5 = scalar_lea.vmem %s416_s16, 32 }
  0x17   :  { %469 = vmatpush3.msra.mxu0 %v208_v8  ;;  %484 = vmatpush3.msra.mxu1 %v297_v14  ;;  %p527_p5 = scmp.ne.s32.totalorder %s416_s16, %s526_s5  ;;  %p532_p7 = scmp.lt.s32.totalorder %s526_s5, %s526_s5 }
  0x18   :  { %470 = vmatprep.subr.mxu0 %v551_v0  ;;  %485 = vmatprep.subr.mxu1 %v551_v0 }
  0x19   :  { %471 = vmatpush3.msra.mxu0 %v207_v9  ;;  %486 = vmatpush3.msra.mxu1 %v296_v15  ;;  %p533_p8 = por %p532_p7, %p531_p6 }
  0x1a   :  { %472 = vmatprep.subr.mxu0 %v551_v0  ;;  %487 = vmatprep.subr.mxu1 %v551_v0 }
  0x1b   :  { %473 = vmatpush3.msra.mxu0 %v206_v10  ;;  %488 = vmatpush3.msra.mxu1 %v295_v16  ;;  %p534_p9 = pnand %p533_p8, %p527_p5 }
  0x1c   :  { %474 = vmatprep.subr.mxu0 %v551_v0  ;;  %489 = vmatprep.subr.mxu1 %v551_v0 }
  0x1d   :  { %475 = vmatpush3.msra.mxu0 %v205_v11  ;;  %490 = vmatpush3.msra.mxu1 %v294_v17 }
  0x1e   :  { %476 = vmatprep.subr.mxu0 %v551_v0  ;;  %491 = vmatprep.subr.mxu1 %v551_v0 }
  0x1f   :  { %477 = vmatpush3.msra.mxu0 %v204_v12  ;;  %492 = vmatpush3.msra.mxu1 %v293_v18 }
  0x20   :  { %478 = vmatprep.subr.mxu0 %v551_v0  ;;  %493 = vmatprep.subr.mxu1 %v551_v0 }
  0x21   :  { %479 = vmatpush3.msra.mxu0 %v203_v13  ;;  %494 = vmatpush3.msra.mxu1 %v292_v31 }
  0x22   :  { %495 = vmatprep.subr.mxu1 %v551_v0 }
  0x23   :  { %496 = vmatpush3.msra.mxu1 %v291_v32 }
  0x24   :  { %497 = vmatprep.subr.mxu1 %v551_v0 }
  0x25   :  { %498 = vmatpush3.msra.mxu1 %v290_v33 }
  0xd1   :  { %v119_v23 = vpop.f32.mrf.mxu0 }
  0xd3   :  { %v456_v25 = vpop.f32.mrf.mxu0  ;;  %v193_v26 = vpop.f32.mrf.mxu1 }
  0xd4   :  { %v194_v27 = vadd.f32 %v193_v26, %v119_v23 }
  0xd5   :  { %v463_v28 = vpop.f32.mrf.mxu1 }
  0xd6   :  { %v201_v29 = vadd.f32 %v200_v24, %v194_v27 }
  0xd8   :  { %v202_v30 = vmax.f32 %v201_v29, 0.0 }
  0xda   :  { %481 = vmatmul.mubr.msk.f32.vlgmr.msra.gmra.mxu0 %vm215_vm4, %v202_v30 }
 0x19a   :  { %v285_v36 = vpop.f32.mrf.mxu0 }
 0x19b   :  { %v286_v37 = vadd.f32 %v285_v36, %v214_v35 }
 0x19c   :  { %v482_v38 = vpop.f32.mrf.mxu0 }
 0x19d   :  { %v289_v39 = vmax.f32 %v286_v37, 0.0 }
 0x19f   :  { %500 = vmatmul.mubr.msk.f32.vlgmr.msra.gmra.mxu1 %vm215_vm4, %v289_v39 }
 0x25f   :  { %v371_v42 = vpop.f32.mrf.mxu1 }
 0x260   :  { %v372_v43 = vadd.f32 %v371_v42, %v301_v41 }
 0x261   :  { %v501_v44 = vpop.f32.mrf.mxu1 }
 0x262   :  { %375 = vxpose.xlu0.b32.start.end [1/1] (short) (narrow) %v372_v43, 8 }
 0x2de   :  { %v391_v45 = vpop.trf.xlu0 }
 0x2df   :  { %408 = vst.msk [vmem:[#allocation5] sm:$0x3] %vm407_vm5, %v391_v45 }
 0x2e0   :  { %537 = shalt.err (!%p534_p9)
}
 0x2e1   :  { %418 = dma.vmem_to_hbm [thread:$0]  %s416_s16, 32, %s699_s7, [#allocation4]  }
 0x2e2   :  { %548 = dma.done.wait [#allocation4], 32  }
 0x2e3   :  { %549 = vsyncadd [#allocation4], 4294967264 }
 0x2e4   :  { %422 = vsyncpa [#allocation3], 1 }
 0x2e5   :  { %423 = vsyncpa [#allocation4], 1 }

</bundles_post_ra>
